<compile_context>
chip_gen: v6e
topology: v6e:2x2x1
jax: 0.10.0
libtpu: 0.0.40
codegen_flags: <defaults>
</compile_context>

<pallas_src>
import functools
import numpy as np

import jax
import jax.numpy as jnp
from jax import lax
from jax.experimental import pallas as pl
from jax.experimental.pallas import tpu as pltpu


CFG = dict(
    mask_rate=0.5, window_size=5, st_sep=2, topk=3, encoder_depth=1,
    c_in=4, d_model=32, n_head=2, input_len=16, is_norm=True,
    time_block=4, CI=True, mask_num=2, tau=0.2, part='s', decomp='fft',
)


# ----------------------------------------------------------------------------
# Fused Pallas kernel:
#   Pooler_Head -> F.normalize -> Gram (once) -> contrastive KL ->
#   aggregation (first `keep` rows) -> Flatten_Head projection -> recon MSE
# ----------------------------------------------------------------------------

def _simmtm_head_kernel(x_ref, w1_ref, b1_ref, w2_ref, b2_ref, aproj_ref,
                        pb_ref, tgt_ref, out_ref,
                        *, inv_tau, sqrt_inv_tau, keep, n_total, mask_num):
    oral = n_total // (mask_num + 1)      # rows per mask-copy group (== keep here)

    # --- Pooler_Head: Flatten -> Linear(pn, pn//2) -> BN(eval, folded) -> ReLU
    #     -> Linear(pn//2, 128).  Token-embedding circular conv + identity encoder
    #     and the BN eval scale are folded into w1_ref / b1_ref. ---
    x32 = x_ref[...]                                                   # (N, L) f32
    xb = x32.astype(jnp.bfloat16)                                      # bf16 MXU feed
    h = jnp.dot(xb, w1_ref[...], preferred_element_type=jnp.float32) + b1_ref[...]
    h = jnp.maximum(h, 0.0)                                            # (N, pn//2) f32
    patch = jnp.dot(h.astype(jnp.bfloat16), w2_ref[...],
                    preferred_element_type=jnp.float32) + b2_ref[...]  # (N, 128) f32

    # --- F.normalize(dim=-1) with 1/tau folded in (rows scaled to norm sqrt(1/tau)) ---
    ss = jnp.sum(patch * patch, axis=-1, keepdims=True)
    pnorm_s = patch * (lax.rsqrt(jnp.maximum(ss, 1e-24)) * sqrt_inv_tau)
    pnb = pnorm_s.astype(jnp.bfloat16)                                 # (N, 128) bf16
    pnb32 = pnb.astype(jnp.float32)                                    # matches MXU operands

    # --- Gram matrix computed ONCE (already scaled by 1/tau) ---
    logits = lax.dot_general(pnb, pnb, (((1,), (1,)), ((), ())),
                             preferred_element_type=jnp.float32)       # (N, N) f32

    # --- Exact diagonal + structural positives (no (N,N) masks / iotas):
    #     positives of row i are {j : j ≡ i (mod oral), j != i}; per-group column sums
    #     of pnb give sum_j logits_ij over each group in O(N·D). ---
    diag_logits = jnp.sum(pnb32 * pnb32, axis=-1, keepdims=True)       # (N, 1) ≈ 1/tau
    gsum = pnb32[0:oral, :]
    for m in range(1, mask_num + 1):
        gsum = gsum + pnb32[m * oral:(m + 1) * oral, :]                # (oral, 128)
    gtile = jnp.concatenate([gsum] * (mask_num + 1), axis=0)           # (N, 128)
    pos_logits = jnp.sum(pnb32 * gtile, axis=-1, keepdims=True) - diag_logits  # (N, 1)

    # --- exp with the constant 1/tau subtracted (cancels exactly; keeps f32 exp safe) ---
    e = jnp.exp(logits - inv_tau)                                      # (N, N)
    diag_e = jnp.exp(diag_logits - inv_tau)                            # (N, 1)
    rowsum = jnp.sum(e, axis=1, keepdims=True) - diag_e                # (N, 1), diag removed

    # --- ContrastiveWeight: KLDivLoss('batchmean') over [positives | negatives] with
    #     0/1 targets (sum t·log t == 0): per row = n_pos·logsumexp_{k!=i} - sum_pos logits.
    #     Each row has exactly mask_num positives. ---
    n_pos = float(mask_num)
    per_row = n_pos * (jnp.log(rowsum) + inv_tau) - pos_logits         # (N, 1)
    closs = jnp.sum(per_row, axis=0, keepdims=True) * (1.0 / n_total)  # (1, 1)

    # --- SimMTM aggregation: only the first `keep` rows are consumed downstream;
    #     diagonal contribution removed via the exact correction. ---
    inv_den = pl.reciprocal(rowsum[:keep, :], approx=True)             # EUP reciprocal
    score = e[:keep, :] * inv_den                                      # (keep, N)
    agg = jnp.dot(score.astype(jnp.bfloat16), xb,
                  preferred_element_type=jnp.float32)                  # (keep, L)
    agg = agg - (diag_e[:keep, :] * inv_den) * x32[:keep, :]           # remove diag term

    # --- Flatten_Head projection (folded through the embedding) + recon MSE ---
    pred = jnp.dot(agg.astype(jnp.bfloat16), aproj_ref[...],
                   preferred_element_type=jnp.float32) + pb_ref[...]   # (keep, pred_len)
    diff = pred - tgt_ref[...]
    sq_row = jnp.sum(diff * diff, axis=1, keepdims=True)               # (keep, 1)
    rloss = jnp.sum(sq_row, axis=0, keepdims=True) * (
        1.0 / float(keep * tgt_ref.shape[1]))                          # (1, 1)

    # --- single merged (1, 2) output: [recon MSE, contrastive KL] ---
    out_ref[...] = jnp.concatenate([rloss, closs], axis=1)


def fused_simmtm_head(x_seq, fparams, target, *, tau, keep, mask_num):
    """One pallas_call covering the whole post-masking pipeline; returns a (1, 2)
    array [reconstruction MSE, contrastive KL]."""
    n_total, L = x_seq.shape
    H = fparams['w1f'].shape[1]
    D = fparams['w2'].shape[1]
    P = fparams['a_proj'].shape[1]
    kernel = functools.partial(
        _simmtm_head_kernel,
        inv_tau=float(1.0 / tau), sqrt_inv_tau=float(np.sqrt(1.0 / tau)),
        keep=int(keep), n_total=int(n_total), mask_num=int(mask_num))
    losses = pl.pallas_call(
        kernel,
        out_shape=jax.ShapeDtypeStruct((1, 2), jnp.float32),
        grid=(1,),
        in_specs=[
            pl.BlockSpec((n_total, L), lambda i: (0, 0)),             # x_seq (f32)
            pl.BlockSpec((L, H), lambda i: (0, 0)),                   # folded w1 (bf16)
            pl.BlockSpec((1, H), lambda i: (0, 0)),                   # folded b1 (f32)
            pl.BlockSpec((H, D), lambda i: (0, 0)),                   # w2 (bf16)
            pl.BlockSpec((1, D), lambda i: (0, 0)),                   # b2 (f32)
            pl.BlockSpec((L, P), lambda i: (0, 0)),                   # folded proj (bf16)
            pl.BlockSpec((1, P), lambda i: (0, 0)),                   # proj bias (f32)
            pl.BlockSpec((keep, target.shape[1]), lambda i: (0, 0)),  # recon target (f32)
        ],
        out_specs=pl.BlockSpec((1, 2), lambda i: (0, 0)),
        # grid=(1,) minimizes launch overhead at demo shapes; for production N:
        # add a parallel row axis (v7x megacore), stream the Gram / row-sum /
        # aggregation in column blocks (flash-style), pad N & keep to 16, and set
        # vmem_limit_bytes explicitly.
        compiler_params=pltpu.CompilerParams(
            dimension_semantics=("arbitrary",)),
    )(x_seq, fparams['w1f'], fparams['b1'], fparams['w2'], fparams['b2'],
      fparams['a_proj'], fparams['proj_b'], target)
    return losses


# ----------------------------------------------------------------------------
# Plain-JAX glue (FFT, top-k, masking, loss combine)
# ----------------------------------------------------------------------------

def instance_norm(x):
    # TODO(synk): instance_norm helper is not defined in the source file;
    # standard RevIN-style normalization over the time axis is used.
    means = jnp.mean(x, axis=1, keepdims=True)
    stdev = jnp.sqrt(jnp.var(x, axis=1, keepdims=True) + 1e-5)
    return (x - means) / stdev, means, stdev


def fft_decomp(x, st_sep, padding_rate=9):
    # TODO(synk): FFT has no Pallas equivalent -> jnp.fft on this path.
    B, L, C = x.shape
    pad = jnp.zeros((B, L * padding_rate, C), x.dtype)
    xp = jnp.concatenate([x, pad], axis=1)
    n = xp.shape[1]
    xf = jnp.fft.rfft(xp, axis=1)
    cutoff = int(st_sep * (padding_rate + 1))
    x_s = xf.at[:, :cutoff, :].set(0)
    x_t = xf - x_s
    x_s_t = jnp.fft.irfft(x_s, n=n, axis=1)[:, :L, :].astype(x.dtype)
    x_t_t = jnp.fft.irfft(x_t, n=n, axis=1)[:, :L, :].astype(x.dtype)
    return x_s_t, x_t_t


def topk_fft_decomp(x, k, eps=1e-6):
    L = x.shape[1]
    xf = jnp.fft.rfft(x, axis=1)                                   # (B, F, C)
    amp = jnp.sqrt((xf.real + eps) ** 2 + (xf.imag + eps) ** 2)    # matches convert_coeff
    amp_t = jnp.transpose(amp, (0, 2, 1))                          # (B, C, F)
    _, idx = lax.top_k(amp_t, k)                                   # (B, C, k)
    nfreq = amp_t.shape[-1]
    mask = jnp.sum(jax.nn.one_hot(idx, nfreq, dtype=jnp.float32), axis=2)
    mask = jnp.transpose(mask, (0, 2, 1))                          # (B, F, C)
    xf = xf * mask
    x_rec = jnp.fft.irfft(xf, n=L, axis=1).astype(x.dtype)
    return x_rec, x - x_rec


def generate_mask_series(key, x, mask_num, mask_rate, input_len):
    """mask_func repeated mask_num times, concatenated along batch (is_rand path)."""
    N, L, D = x.shape
    len_keep = int(input_len * (1 - mask_rate))
    xs, restores = [], []
    for i in range(mask_num):
        k = jax.random.fold_in(key, i)
        noise = jax.random.uniform(k, (N, input_len))
        ids_shuffle = jnp.argsort(noise, axis=1)
        ids_keep_restore = jnp.sort(ids_shuffle[:, :len_keep], axis=1)
        ids_restore = jnp.argsort(
            jnp.concatenate([ids_keep_restore, ids_shuffle[:, len_keep:]], axis=1),
            axis=1)
        x_kept = jnp.take_along_axis(x, ids_keep_restore[:, :, None], axis=1)
        xs.append(x_kept)
        restores.append(ids_restore)
    x_masked = jnp.concatenate(xs, axis=0)
    ids_restore = jnp.concatenate(restores, axis=0)
    mask_tokens = jnp.zeros(
        (ids_restore.shape[0], int(input_len * mask_rate), D), x.dtype)
    x_masked = jnp.concatenate([x_masked, mask_tokens], axis=1)
    x_masked = jnp.take_along_axis(x_masked, ids_restore[:, :, None], axis=1)
    return x_masked


def automatic_weighted_loss(loss1, loss2):
    # params initialised to ones -> 0.5*loss + log(2) each
    p = jnp.ones((2,), jnp.float32)
    out = 0.5 / p[0] ** 2 * loss1 + jnp.log(1 + p[0] ** 2)
    out = out + 0.5 / p[1] ** 2 * loss2 + jnp.log(1 + p[1] ** 2)
    return out


# ----------------------------------------------------------------------------
# Params, weight folding and forward
# ----------------------------------------------------------------------------

def xavier_uniform(key, shape):
    fan_in, fan_out = shape[0], shape[1]
    lim = np.sqrt(6.0 / (fan_in + fan_out))
    return jax.random.uniform(key, shape, jnp.float32, -lim, lim)


def init_params(key):
    c = CFG
    pn = c['input_len'] * c['d_model']
    ks = jax.random.split(key, 8)
    emb_cin = 1 if c['CI'] else c['c_in']
    return dict(
        emb_w=xavier_uniform(ks[0], (3 * emb_cin, c['d_model'])),   # kernel-3 circular conv taps
        pool_w1=xavier_uniform(ks[1], (pn, pn // 2)),
        pool_b1=jnp.zeros((pn // 2,), jnp.float32),
        pool_w2=xavier_uniform(ks[2], (pn // 2, 128)),
        pool_b2=jnp.zeros((128,), jnp.float32),
        proj_w=xavier_uniform(ks[3], (pn, c['input_len'])),         # Flatten_Head linear
        proj_b=jnp.zeros((c['input_len'],), jnp.float32),
    )


def fold_params(params, cfg):
    """One-time weight fold (also pre-casts MXU operands to bf16 exactly once).

    With the encoder treated as identity, the circular-conv token embedding,
    Flatten, and the downstream linears compose:   h_flat = x_seq @ A_emb
      * pooler linear-1 + BN(eval):  x_seq @ (A_emb @ pool_w1 * bn_scale)  -> w1f
      * Flatten_Head:                (score @ x_seq) @ (A_emb @ proj_w)    -> a_proj
    This removes the K=3 embedding matmul, the (N, L*d_model) intermediates, the
    per-call bn_scale multiply and all per-call weight convert ops.
    """
    L, d_model = cfg['input_len'], cfg['d_model']
    emb_w = params['emb_w'].astype(jnp.float32)
    assert emb_w.shape[0] == 3, "weight fold assumes CI=True (single input channel)"
    eye = jnp.eye(L, dtype=jnp.float32)
    # taps[k][m, l] == 1 iff source index m feeds output position l for tap k
    taps = jnp.stack([jnp.roll(eye, -1, axis=0),    # x[l-1]  (circular)
                      eye,                          # x[l]
                      jnp.roll(eye, 1, axis=0)])    # x[l+1]  (circular)
    a_emb = jnp.einsum('kml,kd->mld', taps, emb_w).reshape(L, L * d_model)
    # TODO(synk): BatchNorm1d is modeled as eval-mode with fresh running stats
    # (mean 0, var 1); training-mode batch statistics would diverge from this.
    bn_scale = float(1.0 / np.sqrt(1.0 + 1e-5))
    return dict(
        w1f=((a_emb @ params['pool_w1']) * bn_scale).astype(jnp.bfloat16),
        b1=(params['pool_b1'] * bn_scale).reshape(1, -1).astype(jnp.float32),
        w2=params['pool_w2'].astype(jnp.bfloat16),
        b2=params['pool_b2'].reshape(1, -1).astype(jnp.float32),
        a_proj=(a_emb @ params['proj_w']).astype(jnp.bfloat16),
        proj_b=params['proj_b'].reshape(1, -1).astype(jnp.float32),
    )


def simmtm_forward(fparams, x, mask_key):
    c = CFG
    B, L, C = x.shape
    assert L == c['input_len'] and C == c['c_in']

    # instance norm
    xn, means, stdev = instance_norm(x)

    # decomposition (decomp == 'fft')
    x_s_, x_t_ = fft_decomp(xn, c['st_sep'], padding_rate=9)
    x_s_, x_res = topk_fft_decomp(x_s_, c['topk'])
    x_t = x_t_ / jnp.sqrt(jnp.var(x_t_, axis=1, keepdims=True) + 1e-5)  # unused (part=='s'); DCE'd
    x_s = topk_fft_decomp(x_s_, c['topk'])[0]

    # CI=True: (B, L, C) -> (B*C, L, 1)
    x_s_ci = jnp.transpose(x_s, (0, 2, 1)).reshape(B * C, L)[..., None]

    # random masking (mask_num masked copies) concatenated along batch
    x_s_masked = generate_mask_series(mask_key, x_s_ci, c['mask_num'],
                                      c['mask_rate'], c['input_len'])
    x_all = jnp.concatenate([x_s_ci, x_s_masked], axis=0)          # (N_total, L, 1)
    n_total = x_all.shape[0]
    keep = B * C
    x_seq = x_all.reshape(n_total, L)                               # f32, cast in-kernel

    # reconstruction target in channel-major layout matching the prediction rows
    target = jnp.transpose(x_s_, (0, 2, 1)).reshape(keep, L)

    # TODO(synk): ResidualDecompEncoder / transformer Encoder classes are not
    # provided in the source; encoder_s is treated as identity (this enables the
    # embedding/projection weight folds).
    # TODO(synk): the source forward references undefined `contrastive_loss_s`;
    # it is computed via ContrastiveWeight(tau, mask_num) as intended (positives
    # are generated structurally inside the kernel, no host mask build).
    # TODO(synk): the source aggregation() mixes patch-level indexing with a
    # per-series pooler output (shape-inconsistent); the SimMTM point-wise
    # weighted aggregation over the (mask_num+1)*B*C batch is implemented.
    losses = fused_simmtm_head(x_seq, fparams, target,
                               tau=c['tau'], keep=keep, mask_num=c['mask_num'])
    loss_recons, contrastive_loss = losses[0, 0], losses[0, 1]

    loss = automatic_weighted_loss(loss_recons, contrastive_loss)
    return xn, loss


# ----------------------------------------------------------------------------

if __name__ == "__main__":
    key = jax.random.PRNGKey(0)
    k_param, k_data, k_mask = jax.random.split(key, 3)

    params = init_params(k_param)
    fparams = fold_params(params, CFG)   # precomputed conv/flatten/linear/bn folds (bf16)
    x = jax.random.normal(k_data, (2, CFG['input_len'], CFG['c_in']), jnp.float32)

    fwd = jax.jit(simmtm_forward)
    xn, loss = fwd(fparams, x, k_mask)
    jax.block_until_ready((xn, loss))
    assert xn.shape == (2, CFG['input_len'], CFG['c_in'])
    assert jnp.isfinite(loss)
    print("KERNEL_OK")
</pallas_src>

<mosaic_0001>
module attributes {stable_mosaic.version = 11 : i64} {
  func.func @_simmtm_head_kernel(%arg0: i32, %arg1: memref<24x16xf32, #tpu.memory_space<vmem>>, %arg2: memref<16x256xbf16, #tpu.memory_space<vmem>>, %arg3: memref<1x256xf32, #tpu.memory_space<vmem>>, %arg4: memref<256x128xbf16, #tpu.memory_space<vmem>>, %arg5: memref<1x128xf32, #tpu.memory_space<vmem>>, %arg6: memref<16x16xbf16, #tpu.memory_space<vmem>>, %arg7: memref<1x16xf32, #tpu.memory_space<vmem>>, %arg8: memref<8x16xf32, #tpu.memory_space<vmem>>, %arg9: memref<1x2xf32, #tpu.memory_space<vmem>>) attributes {dimension_semantics = [#tpu.dimension_semantics<arbitrary>], iteration_bounds = array<i64: 1>, scalar_prefetch = 0 : i64, scratch_operands = 0 : i64, tpu.core_type = #tpu.core_type<tc>, window_params = [{pipeline_mode = #tpu.pipeline_mode<synchronous>, transform_indices = @transform_0, window_bounds = array<i64: 24, 16>}, {pipeline_mode = #tpu.pipeline_mode<synchronous>, transform_indices = @transform_1, window_bounds = array<i64: 16, 256>}, {pipeline_mode = #tpu.pipeline_mode<synchronous>, transform_indices = @transform_2, window_bounds = array<i64: 1, 256>}, {pipeline_mode = #tpu.pipeline_mode<synchronous>, transform_indices = @transform_3, window_bounds = array<i64: 256, 128>}, {pipeline_mode = #tpu.pipeline_mode<synchronous>, transform_indices = @transform_4, window_bounds = array<i64: 1, 128>}, {pipeline_mode = #tpu.pipeline_mode<synchronous>, transform_indices = @transform_5, window_bounds = array<i64: 16, 16>}, {pipeline_mode = #tpu.pipeline_mode<synchronous>, transform_indices = @transform_6, window_bounds = array<i64: 1, 16>}, {pipeline_mode = #tpu.pipeline_mode<synchronous>, transform_indices = @transform_7, window_bounds = array<i64: 8, 16>}, {pipeline_mode = #tpu.pipeline_mode<synchronous>, transform_indices = @transform_8, window_bounds = array<i64: 1, 2>}]} {
    %c0 = arith.constant 0 : index
    %c0_0 = arith.constant 0 : index
    %0 = vector.load %arg1[%c0, %c0_0] : memref<24x16xf32, #tpu.memory_space<vmem>>, vector<24x16xf32>
    %1 = arith.truncf %0 : vector<24x16xf32> to vector<24x16xbf16>
    %c0_1 = arith.constant 0 : index
    %c0_2 = arith.constant 0 : index
    %2 = vector.load %arg2[%c0_1, %c0_2] : memref<16x256xbf16, #tpu.memory_space<vmem>>, vector<16x256xbf16>
    %cst = arith.constant dense<0.000000e+00> : vector<24x256xf32>
    %3 = tpu.matmul %1, %2, %cst {dimension_numbers = #tpu.dot_dimension_numbers<[1], [0], [0], [1], [0, 0, 1, 1], [], []>} : vector<24x16xbf16>, vector<16x256xbf16>, vector<24x256xf32> -> vector<24x256xf32>
    %c0_3 = arith.constant 0 : index
    %c0_4 = arith.constant 0 : index
    %4 = vector.load %arg3[%c0_3, %c0_4] : memref<1x256xf32, #tpu.memory_space<vmem>>, vector<1x256xf32>
    %5 = vector.broadcast %4 : vector<1x256xf32> to vector<24x256xf32>
    %6 = arith.addf %3, %5 : vector<24x256xf32>
    %cst_5 = arith.constant 0.000000e+00 : f32
    %7 = vector.broadcast %cst_5 : f32 to vector<24x256xf32>
    %8 = arith.maximumf %6, %7 : vector<24x256xf32>
    %9 = arith.truncf %8 : vector<24x256xf32> to vector<24x256xbf16>
    %c0_6 = arith.constant 0 : index
    %c0_7 = arith.constant 0 : index
    %10 = vector.load %arg4[%c0_6, %c0_7] : memref<256x128xbf16, #tpu.memory_space<vmem>>, vector<256x128xbf16>
    %cst_8 = arith.constant dense<0.000000e+00> : vector<24x128xf32>
    %11 = tpu.matmul %9, %10, %cst_8 {dimension_numbers = #tpu.dot_dimension_numbers<[1], [0], [0], [1], [0, 0, 1, 1], [], []>} : vector<24x256xbf16>, vector<256x128xbf16>, vector<24x128xf32> -> vector<24x128xf32>
    %c0_9 = arith.constant 0 : index
    %c0_10 = arith.constant 0 : index
    %12 = vector.load %arg5[%c0_9, %c0_10] : memref<1x128xf32, #tpu.memory_space<vmem>>, vector<1x128xf32>
    %13 = vector.broadcast %12 : vector<1x128xf32> to vector<24x128xf32>
    %14 = arith.addf %11, %13 : vector<24x128xf32>
    %15 = arith.mulf %14, %14 : vector<24x128xf32>
    %cst_11 = arith.constant dense<0.000000e+00> : vector<24xf32>
    %16 = vector.multi_reduction <add>, %15, %cst_11 [1] : vector<24x128xf32> to vector<24xf32>
    %17 = vector.shape_cast %16 : vector<24xf32> to vector<24x1xf32>
    %cst_12 = arith.constant 1.000000e-24 : f32
    %18 = vector.broadcast %cst_12 : f32 to vector<24x1xf32>
    %19 = arith.maximumf %17, %18 : vector<24x1xf32>
    %20 = math.rsqrt %19 : vector<24x1xf32>
    %cst_13 = arith.constant 2.23606801 : f32
    %21 = vector.broadcast %cst_13 : f32 to vector<24x1xf32>
    %22 = arith.mulf %20, %21 : vector<24x1xf32>
    %23 = vector.broadcast %22 : vector<24x1xf32> to vector<24x128xf32>
    %24 = arith.mulf %14, %23 : vector<24x128xf32>
    %25 = arith.truncf %24 : vector<24x128xf32> to vector<24x128xbf16>
    %26 = arith.extf %25 : vector<24x128xbf16> to vector<24x128xf32>
    %cst_14 = arith.constant dense<0.000000e+00> : vector<24x24xf32>
    %27 = tpu.matmul %25, %25, %cst_14 {dimension_numbers = #tpu.dot_dimension_numbers<[1], [1], [0], [0], [0, 0, 1, 0], [], []>} : vector<24x128xbf16>, vector<24x128xbf16>, vector<24x24xf32> -> vector<24x24xf32>
    %28 = arith.mulf %26, %26 : vector<24x128xf32>
    %cst_15 = arith.constant dense<0.000000e+00> : vector<24xf32>
    %29 = vector.multi_reduction <add>, %28, %cst_15 [1] : vector<24x128xf32> to vector<24xf32>
    %30 = vector.shape_cast %29 : vector<24xf32> to vector<24x1xf32>
    %31 = vector.extract_strided_slice %26 {offsets = [0, 0], sizes = [8, 128], strides = [1, 1]} : vector<24x128xf32> to vector<8x128xf32>
    %32 = vector.extract_strided_slice %26 {offsets = [8, 0], sizes = [8, 128], strides = [1, 1]} : vector<24x128xf32> to vector<8x128xf32>
    %33 = arith.addf %31, %32 : vector<8x128xf32>
    %34 = vector.extract_strided_slice %26 {offsets = [16, 0], sizes = [8, 128], strides = [1, 1]} : vector<24x128xf32> to vector<8x128xf32>
    %35 = arith.addf %33, %34 : vector<8x128xf32>
    %36 = tpu.concatenate %35, %35, %35 in 0 : vector<8x128xf32>, vector<8x128xf32>, vector<8x128xf32> -> vector<24x128xf32>
    %37 = arith.mulf %26, %36 : vector<24x128xf32>
    %cst_16 = arith.constant dense<0.000000e+00> : vector<24xf32>
    %38 = vector.multi_reduction <add>, %37, %cst_16 [1] : vector<24x128xf32> to vector<24xf32>
    %39 = vector.shape_cast %38 : vector<24xf32> to vector<24x1xf32>
    %40 = arith.subf %39, %30 : vector<24x1xf32>
    %cst_17 = arith.constant 5.000000e+00 : f32
    %41 = vector.broadcast %cst_17 : f32 to vector<24x24xf32>
    %42 = arith.subf %27, %41 : vector<24x24xf32>
    %43 = math.exp %42 : vector<24x24xf32>
    %cst_18 = arith.constant 5.000000e+00 : f32
    %44 = vector.broadcast %cst_18 : f32 to vector<24x1xf32>
    %45 = arith.subf %30, %44 : vector<24x1xf32>
    %46 = math.exp %45 : vector<24x1xf32>
    %cst_19 = arith.constant dense<0.000000e+00> : vector<24xf32>
    %47 = vector.multi_reduction <add>, %43, %cst_19 [1] : vector<24x24xf32> to vector<24xf32>
    %48 = vector.shape_cast %47 : vector<24xf32> to vector<24x1xf32>
    %49 = arith.subf %48, %46 : vector<24x1xf32>
    %50 = math.log %49 : vector<24x1xf32>
    %cst_20 = arith.constant 5.000000e+00 : f32
    %51 = vector.broadcast %cst_20 : f32 to vector<24x1xf32>
    %52 = arith.addf %50, %51 : vector<24x1xf32>
    %cst_21 = arith.constant 2.000000e+00 : f32
    %53 = vector.broadcast %cst_21 : f32 to vector<24x1xf32>
    %54 = arith.mulf %53, %52 : vector<24x1xf32>
    %55 = arith.subf %54, %40 : vector<24x1xf32>
    %cst_22 = arith.constant dense<0.000000e+00> : vector<1xf32>
    %56 = vector.multi_reduction <add>, %55, %cst_22 [0] : vector<24x1xf32> to vector<1xf32>
    %57 = vector.shape_cast %56 : vector<1xf32> to vector<1x1xf32>
    %cst_23 = arith.constant 0.0416666679 : f32
    %58 = vector.broadcast %cst_23 : f32 to vector<1x1xf32>
    %59 = arith.mulf %57, %58 : vector<1x1xf32>
    %60 = vector.extract_strided_slice %49 {offsets = [0, 0], sizes = [8, 1], strides = [1, 1]} : vector<24x1xf32> to vector<8x1xf32>
    %61 = tpu.reciprocal %60 {approx = true} : vector<8x1xf32> -> vector<8x1xf32>
    %62 = vector.extract_strided_slice %43 {offsets = [0, 0], sizes = [8, 24], strides = [1, 1]} : vector<24x24xf32> to vector<8x24xf32>
    %63 = vector.broadcast %61 : vector<8x1xf32> to vector<8x24xf32>
    %64 = arith.mulf %62, %63 : vector<8x24xf32>
    %65 = arith.truncf %64 : vector<8x24xf32> to vector<8x24xbf16>
    %cst_24 = arith.constant dense<0.000000e+00> : vector<8x16xf32>
    %66 = tpu.matmul %65, %1, %cst_24 {dimension_numbers = #tpu.dot_dimension_numbers<[1], [0], [0], [1], [0, 0, 1, 1], [], []>} : vector<8x24xbf16>, vector<24x16xbf16>, vector<8x16xf32> -> vector<8x16xf32>
    %67 = vector.extract_strided_slice %46 {offsets = [0, 0], sizes = [8, 1], strides = [1, 1]} : vector<24x1xf32> to vector<8x1xf32>
    %68 = arith.mulf %67, %61 : vector<8x1xf32>
    %69 = vector.extract_strided_slice %0 {offsets = [0, 0], sizes = [8, 16], strides = [1, 1]} : vector<24x16xf32> to vector<8x16xf32>
    %70 = vector.broadcast %68 : vector<8x1xf32> to vector<8x16xf32>
    %71 = arith.mulf %70, %69 : vector<8x16xf32>
    %72 = arith.subf %66, %71 : vector<8x16xf32>
    %73 = arith.truncf %72 : vector<8x16xf32> to vector<8x16xbf16>
    %c0_25 = arith.constant 0 : index
    %c0_26 = arith.constant 0 : index
    %74 = vector.load %arg6[%c0_25, %c0_26] : memref<16x16xbf16, #tpu.memory_space<vmem>>, vector<16x16xbf16>
    %cst_27 = arith.constant dense<0.000000e+00> : vector<8x16xf32>
    %75 = tpu.matmul %73, %74, %cst_27 {dimension_numbers = #tpu.dot_dimension_numbers<[1], [0], [0], [1], [0, 0, 1, 1], [], []>} : vector<8x16xbf16>, vector<16x16xbf16>, vector<8x16xf32> -> vector<8x16xf32>
    %c0_28 = arith.constant 0 : index
    %c0_29 = arith.constant 0 : index
    %76 = vector.load %arg7[%c0_28, %c0_29] : memref<1x16xf32, #tpu.memory_space<vmem>>, vector<1x16xf32>
    %77 = vector.broadcast %76 : vector<1x16xf32> to vector<8x16xf32>
    %78 = arith.addf %75, %77 : vector<8x16xf32>
    %c0_30 = arith.constant 0 : index
    %c0_31 = arith.constant 0 : index
    %79 = vector.load %arg8[%c0_30, %c0_31] : memref<8x16xf32, #tpu.memory_space<vmem>>, vector<8x16xf32>
    %80 = arith.subf %78, %79 : vector<8x16xf32>
    %81 = arith.mulf %80, %80 : vector<8x16xf32>
    %cst_32 = arith.constant dense<0.000000e+00> : vector<8xf32>
    %82 = vector.multi_reduction <add>, %81, %cst_32 [1] : vector<8x16xf32> to vector<8xf32>
    %83 = vector.shape_cast %82 : vector<8xf32> to vector<8x1xf32>
    %cst_33 = arith.constant dense<0.000000e+00> : vector<1xf32>
    %84 = vector.multi_reduction <add>, %83, %cst_33 [0] : vector<8x1xf32> to vector<1xf32>
    %85 = vector.shape_cast %84 : vector<1xf32> to vector<1x1xf32>
    %cst_34 = arith.constant 7.812500e-03 : f32
    %86 = vector.broadcast %cst_34 : f32 to vector<1x1xf32>
    %87 = arith.mulf %85, %86 : vector<1x1xf32>
    %88 = tpu.concatenate %87, %59 in 1 : vector<1x1xf32>, vector<1x1xf32> -> vector<1x2xf32>
    %c0_35 = arith.constant 0 : index
    %c0_36 = arith.constant 0 : index
    %89 = vector.load %arg9[%c0_35, %c0_36] : memref<1x2xf32, #tpu.memory_space<vmem>>, vector<1x2xf32>
    tpu.vector_store %arg9[%c0_35, %c0_36], %88 {strides = array<i32>} : memref<1x2xf32, #tpu.memory_space<vmem>>, vector<1x2xf32>,
    return
  }
  func.func @transform_0(%arg0: i32) -> (i32, i32) {
    %c0_i32 = arith.constant 0 : i32
    %c0_i32_0 = arith.constant 0 : i32
    %c0_i32_1 = arith.constant 0 : i32
    return %c0_i32, %c0_i32_0 : i32, i32
  }
  func.func @transform_1(%arg0: i32) -> (i32, i32) {
    %c0_i32 = arith.constant 0 : i32
    %c0_i32_0 = arith.constant 0 : i32
    %c0_i32_1 = arith.constant 0 : i32
    return %c0_i32, %c0_i32_0 : i32, i32
  }
  func.func @transform_2(%arg0: i32) -> (i32, i32) {
    %c0_i32 = arith.constant 0 : i32
    %c0_i32_0 = arith.constant 0 : i32
    %c0_i32_1 = arith.constant 0 : i32
    return %c0_i32, %c0_i32_0 : i32, i32
  }
  func.func @transform_3(%arg0: i32) -> (i32, i32) {
    %c0_i32 = arith.constant 0 : i32
    %c0_i32_0 = arith.constant 0 : i32
    %c0_i32_1 = arith.constant 0 : i32
    return %c0_i32, %c0_i32_0 : i32, i32
  }
  func.func @transform_4(%arg0: i32) -> (i32, i32) {
    %c0_i32 = arith.constant 0 : i32
    %c0_i32_0 = arith.constant 0 : i32
    %c0_i32_1 = arith.constant 0 : i32
    return %c0_i32, %c0_i32_0 : i32, i32
  }
  func.func @transform_5(%arg0: i32) -> (i32, i32) {
    %c0_i32 = arith.constant 0 : i32
    %c0_i32_0 = arith.constant 0 : i32
    %c0_i32_1 = arith.constant 0 : i32
    return %c0_i32, %c0_i32_0 : i32, i32
  }
  func.func @transform_6(%arg0: i32) -> (i32, i32) {
    %c0_i32 = arith.constant 0 : i32
    %c0_i32_0 = arith.constant 0 : i32
    %c0_i32_1 = arith.constant 0 : i32
    return %c0_i32, %c0_i32_0 : i32, i32
  }
  func.func @transform_7(%arg0: i32) -> (i32, i32) {
    %c0_i32 = arith.constant 0 : i32
    %c0_i32_0 = arith.constant 0 : i32
    %c0_i32_1 = arith.constant 0 : i32
    return %c0_i32, %c0_i32_0 : i32, i32
  }
  func.func @transform_8(%arg0: i32) -> (i32, i32) {
    %c0_i32 = arith.constant 0 : i32
    %c0_i32_0 = arith.constant 0 : i32
    %c0_i32_1 = arith.constant 0 : i32
    return %c0_i32, %c0_i32_0 : i32, i32
  }
}

</mosaic_0001>

<bundles_post_ra>
// kernel: reverse.2
= control target key start
LH: loop header
LB: loop body
LE: loop exit
PB: predicated region body
PF: predicated region fallthrough
CT: control target
= control target key end

     0   :  { %v2_v0 = vlaneseq  ;;  %s155_s0 = inlined_call_operand.vmem [shape: f32[2,4,79], index: 0, kind: input, shape index: {}]   ;;  %s156_s1 = inlined_call_operand.vmem [shape: f32[2,4,79], index: 1, kind: output, shape index: {}]  }
   0x2   :  { %v3_v1 = vsub.s32 78, %v2_v0 }
   0x4   :  { %4 = vset.pattern.permute.xlu0 %v3_v1 }
   0x5   :  { %v21_v2 = vld [vmem:[%s155_s0] sm:$0xff]  }
   0x6   :  { %22 = vst [vmem:[#allocation1] sm:$0xff] %v21_v2  }
   0xd   :  { %v57_v3 = vld [vmem:[#allocation1] sm:$0xf]  ;;  %v54_v4 = vld [vmem:[#allocation1 + $0x4] sm:$0xf] }
   0xe   :  { %58 = vst [vmem:[#allocation0] sm:$0xf] %v57_v3  ;;  %56 = vst [vmem:[#allocation0 + $0x8] sm:$0xf] %v54_v4 }
  0x15   :  { %v59_v5 = vld [vmem:[#allocation0] sm:$0xff]  ;;  %v65_v6 = vld [vmem:[#allocation0 + $0x8] sm:$0xff] }
  0x16   :  { %60 = vperm.xlu0 %4, %v59_v5  }
  0x1a   :  { %66 = vperm.xlu0 %4, %v65_v6  }
  0x91   :  { %v61_v7 = vpop.permute.xlu0 %60 }
  0x92   :  { %62 = vst [vmem:[#allocation2 + $0x8] sm:$0xff] %v61_v7 }
  0x95   :  { %v67_v8 = vpop.permute.xlu0 %66 }
  0x96   :  { %68 = vst [vmem:[#allocation2] sm:$0xff] %v67_v8 }
  0x99   :  { %v73_v9 = vld [vmem:[#allocation2 + $0x8] sm:$0xf] }
  0x9a   :  { %76 = vst [vmem:[#allocation3] sm:$0xf] %v73_v9 }
  0x9d   :  { %v78_v10 = vld [vmem:[#allocation2] sm:$0xf] }
  0x9e   :  { %82 = vst [vmem:[#allocation3 + $0x4] sm:$0xf] %v78_v10 }
  0xa1   :  { %v99_v11 = vld [vmem:[#allocation3] sm:$0xf] }
  0xa2   :  { %100 = vst [vmem:[%s156_s1] sm:$0xf] %v99_v11 }
  0xa5   :  { %v101_v12 = vld [vmem:[#allocation3 + $0x4] sm:$0xf] }
  0xa6   :  { %102 = vst [vmem:[%s156_s1 + $0x4] sm:$0xf] %v101_v12 }

// kernel: reverse.7
= control target key start
LH: loop header
LB: loop body
LE: loop exit
PB: predicated region body
PF: predicated region fallthrough
CT: control target
= control target key end

     0   :  { %v2_v0 = vlaneseq  ;;  %s155_s0 = inlined_call_operand.vmem [shape: f32[2,4,7], index: 0, kind: input, shape index: {}]   ;;  %s156_s1 = inlined_call_operand.vmem [shape: f32[2,4,7], index: 1, kind: output, shape index: {}]  }
   0x2   :  { %v3_v1 = vsub.s32 6, %v2_v0 }
   0x4   :  { %4 = vset.pattern.permute.xlu0 %v3_v1 }
   0x5   :  { %v21_v2 = vld [vmem:[%s155_s0] sm:$0xff]  }
   0x6   :  { %22 = vst [vmem:[#allocation1] sm:$0xff] %v21_v2  }
   0xd   :  { %v57_v3 = vld [vmem:[#allocation1] sm:$0xf]  ;;  %v54_v4 = vld [vmem:[#allocation1 + $0x4] sm:$0xf] }
   0xe   :  { %58 = vst [vmem:[#allocation0] sm:$0xf] %v57_v3  ;;  %56 = vst [vmem:[#allocation0 + $0x8] sm:$0xf] %v54_v4 }
  0x15   :  { %v59_v5 = vld [vmem:[#allocation0] sm:$0xff]  ;;  %v65_v6 = vld [vmem:[#allocation0 + $0x8] sm:$0xff] }
  0x16   :  { %60 = vperm.xlu0 %4, %v59_v5  }
  0x1a   :  { %66 = vperm.xlu0 %4, %v65_v6  }
  0x91   :  { %v61_v7 = vpop.permute.xlu0 %60 }
  0x92   :  { %62 = vst [vmem:[#allocation2 + $0x8] sm:$0xff] %v61_v7 }
  0x95   :  { %v67_v8 = vpop.permute.xlu0 %66 }
  0x96   :  { %68 = vst [vmem:[#allocation2] sm:$0xff] %v67_v8 }
  0x99   :  { %v73_v9 = vld [vmem:[#allocation2 + $0x8] sm:$0xf] }
  0x9a   :  { %76 = vst [vmem:[#allocation3] sm:$0xf] %v73_v9 }
  0x9d   :  { %v78_v10 = vld [vmem:[#allocation2] sm:$0xf] }
  0x9e   :  { %82 = vst [vmem:[#allocation3 + $0x4] sm:$0xf] %v78_v10 }
  0xa1   :  { %v99_v11 = vld [vmem:[#allocation3] sm:$0xf] }
  0xa2   :  { %100 = vst [vmem:[%s156_s1] sm:$0xf] %v99_v11 }
  0xa5   :  { %v101_v12 = vld [vmem:[#allocation3 + $0x4] sm:$0xf] }
  0xa6   :  { %102 = vst [vmem:[%s156_s1 + $0x4] sm:$0xf] %v101_v12 }

// kernel: simmtm_forward.1
= control target key start
LH: loop header
LB: loop body
LE: loop exit
PB: predicated region body
PF: predicated region fallthrough
CT: control target
= control target key end

     0   :  { %v733_v1 = vmov 0   ;;  %vm59_vm0 = vcmask 130048   ;;  %v39_v24 = vlaneseq  ;;  %vm425_vm1 = vcmask 195584   ;;  %s888_s1 = inlined_call_operand.vmem [shape: bf16[16,256], index: 1, kind: input, shape index: {}]   ;;  %s889_s0 = inlined_call_operand.vmem [shape: f32[24,16], index: 0, kind: input, shape index: {}]   ;;  %s890_s3 = inlined_call_operand.vmem [shape: bf16[256,128], index: 3, kind: input, shape index: {}]   ;;  %s891_s2 = inlined_call_operand.vmem [shape: f32[1,256], index: 2, kind: input, shape index: {}]   ;;  %s892_s4 = inlined_call_operand.vmem [shape: f32[1,128], index: 4, kind: input, shape index: {}]   ;;  %s893_s5 = inlined_call_operand.vmem [shape: bf16[16,16], index: 5, kind: input, shape index: {}]   ;;  %s894_s6 = inlined_call_operand.vmem [shape: f32[1,16], index: 6, kind: input, shape index: {}]   ;;  %s895_s7 = inlined_call_operand.vmem [shape: f32[8,16], index: 7, kind: input, shape index: {}]   ;;  %s896_s8 = inlined_call_operand.vmem [shape: f32[1,2], index: 8, kind: output, shape index: {}]  }
   0x1   :  { %v687_v0 = vld [vmem:[%s888_s1 + $0x4] ss:$8 sps:$4 sm:$0xff]   ;;  %98 = vmatprep.mubr.bf16.mxu0 %v733_v1  ;;  %v689_v2 = vld [vmem:[%s888_s1] ss:$8 sps:$4 sm:$0xff]   ;;  %v690_v6 = vld [vmem:[%s890_s3 + $0x78] sm:$0xff]   ;;  %vm468_vm2 = vcmask 1043456  }
   0x2   :  { %v790_v3 = vld [vmem:[%s889_s0] sm:$0xff]  ;;  %v31_v4 = vld [vmem:[%s889_s0 + $0x8] sm:$0xff]  ;;  %80 = vmatprep.subr.bf16.mxu0 %v687_v0  ;;  %v691_v7 = vld [vmem:[%s890_s3 + $0x38] sm:$0xff]   ;;  %625 = vmatprep.subr.bf16.mxu1 %v690_v6  ;;  %v40_v25 = vshrl.u32 %v39_v24, 7  ;;  %vm735_vm3 = vmmov 0   ;;  %vm586_vm4 = vcmask 7168  }
   0x3   :  { %v796_v5 = vpack.c.bf16 %v31_v4, %v790_v3  ;;  %81 = vmatpush1.bf16.msra.mxu0 %v689_v2  ;;  %v32_v8 = vld [vmem:[%s889_s0 + $0x10] sm:$0xff]  ;;  %626 = vmatpush3.bf16.msra.mxu1 %v691_v7  ;;  %v694_v11 = vld [vmem:[%s890_s3 + $0x68] sm:$0xff]   ;;  %v696_v14 = vld [vmem:[%s890_s3 + $0x60] sm:$0xff]   ;;  %vm588_vm5 = vcmask 8192  }
   0x4   :  { %v692_v9 = vld [vmem:[%s890_s3 + $0x70] sm:$0xff]   ;;  %v818_v12 = vpack.c.bf16 %v32_v8, %v32_v8  ;;  %v695_v13 = vld [vmem:[%s890_s3 + $0x28] sm:$0xff]   ;;  %v697_v15 = vld [vmem:[%s890_s3 + $0x20] sm:$0xff]   ;;  %v45_v26 = vsub.s32 1, %v40_v25  ;;  %v41_v27 = vsub.s32 0, %v40_v25 }
   0x5   :  { %v693_v10 = vld [vmem:[%s890_s3 + $0x30] sm:$0xff]   ;;  %627 = vmatprep.subr.bf16.mxu1 %v692_v9  ;;  %v698_v16 = vld [vmem:[%s890_s3 + $0x58] sm:$0xff]   ;;  %v702_v20 = vld [vmem:[%s890_s3 + $0x48] sm:$0xff]  }
   0x6   :  { %596 = vmatmul.mubr.msk.bf16.vlgmr.msra.gmra.mxu0 %vm59_vm0, %v796_v5  ;;  %v699_v17 = vld [vmem:[%s890_s3 + $0x18] sm:$0xff]   ;;  %v700_v18 = vld [vmem:[%s890_s3 + $0x50] sm:$0xff]   ;;  %v703_v21 = vld [vmem:[%s890_s3 + $0x8] sm:$0xff]  }
   0x7   :  { %108 = vmatprep.mubr.bf16.mxu0 %v733_v1  ;;  %628 = vmatpush3.bf16.msra.mxu1 %v693_v10  ;;  %v701_v19 = vld [vmem:[%s890_s3 + $0x10] sm:$0xff]   ;;  %v704_v22 = vld [vmem:[%s890_s3 + $0x40] sm:$0xff]  }
   0x8   :  { %629 = vmatprep.subr.bf16.mxu1 %v694_v11  ;;  %v705_v23 = vld [vmem:[%s890_s3] sm:$0xff]  }
   0x9   :  { %v37_v28 = vld [vmem:[%s891_s2] sm:$0x3] }
   0xa   :  { %v46_v30 = vrot.slane %v37_v28, %v45_v26  ;;  %v42_v31 = vrot.slane %v37_v28, %v41_v27  ;;  %v598_v60 = vld [vmem:[%s892_s4] ss:$0 sm:$0xff] }
   0xb   :  { %630 = vmatpush3.bf16.msra.mxu1 %v695_v13 }
   0xc   :  { %631 = vmatprep.subr.bf16.mxu1 %v696_v14 }
   0xe   :  { %597 = vmatmul.mubr.msk.bf16.gmra.mxu0 %vm59_vm0, %v818_v12 }
   0xf   :  { %632 = vmatpush3.bf16.msra.mxu1 %v697_v15 }
  0x10   :  { %633 = vmatprep.subr.bf16.mxu1 %v698_v16 }
  0x13   :  { %634 = vmatpush3.bf16.msra.mxu1 %v699_v17 }
  0x14   :  { %635 = vmatprep.subr.bf16.mxu1 %v700_v18 }
  0x17   :  { %636 = vmatpush3.bf16.msra.mxu1 %v701_v19 }
  0x18   :  { %637 = vmatprep.subr.bf16.mxu1 %v702_v20 }
  0x1b   :  { %638 = vmatpush3.bf16.msra.mxu1 %v703_v21 }
  0x1c   :  { %639 = vmatprep.subr.bf16.mxu1 %v704_v22 }
  0x1f   :  { %640 = vmatpush3.bf16.msra.mxu1 %v705_v23 }
  0xc6   :  { %v100_v29 = vpop.f32.mrf.mxu0 }
  0xc7   :  { %v101_v36 = vadd.f32 %v100_v29, %v42_v31 }
  0xc8   :  { %v102_v32 = vpop.f32.mrf.mxu0 }
  0xc9   :  { %v103_v34 = vadd.f32 %v102_v32, %v46_v30  ;;  %v117_v43 = vmax.f32 %v101_v36, 0.0 }
  0xca   :  { %v104_v33 = vpop.f32.mrf.mxu0 }
  0xcb   :  { %v105_v35 = vadd.f32 %v104_v33, %v42_v31  ;;  %v118_v41 = vmax.f32 %v103_v34, 0.0 }
  0xcc   :  { %v106_v37 = vpop.f32.mrf.mxu0 }
  0xcd   :  { %v107_v38 = vadd.f32 %v106_v37, %v46_v30  ;;  %v119_v39 = vmax.f32 %v105_v35, 0.0 }
  0xce   :  { %v110_v40 = vpop.f32.mrf.mxu0 }
  0xcf   :  { %v120_v42 = vmax.f32 %v107_v38, 0.0  ;;  %v123_v47 = vpack.c.bf16 %v119_v39, %v117_v43  ;;  %v111_v48 = vadd.f32 %v110_v40, %v42_v31 }
  0xd0   :  { %v112_v44 = vpop.f32.mrf.mxu0 }
  0xd1   :  { %v113_v45 = vadd.f32 %v112_v44, %v46_v30  ;;  %v124_v46 = vpack.c.bf16 %v120_v42, %v118_v41  ;;  %v121_v53 = vmax.f32 %v111_v48, 0.0 }
  0xd2   :  { %v114_v49 = vpop.f32.mrf.mxu0 }
  0xd3   :  { %v122_v50 = vmax.f32 %v113_v45, 0.0  ;;  %294 = vmatprep.mubr.bf16.mxu1 %v124_v46  ;;  %v125_v54 = vpack.c.bf16 %v121_v53, %v121_v53 }
  0xd4   :  { %v115_v51 = vpop.f32.mrf.mxu0  ;;  %295 = vmatmul.mubr.bf16.vlgmr.msra.gmra.mxu1 %v123_v47 }
  0xd5   :  { %v126_v52 = vpack.c.bf16 %v122_v50, %v122_v50 }
  0xd7   :  { %302 = vmatprep.mubr.bf16.mxu1 %v126_v52 }
  0xdc   :  { %303 = vmatmul.mubr.bf16.gmra.mxu1 %v125_v54 }
 0x194   :  { %v641_v55 = vpop.f32.mrf.mxu1 }
 0x196   :  { %v642_v56 = vpop.f32.mrf.mxu1 }
 0x197   :  { %v643_v0 = vadd.f32 %v642_v56, %v641_v55  ;;  %v734_v56 = vmov 0.0  }
 0x198   :  { %v644_v57 = vpop.f32.mrf.mxu1 }
 0x199   :  { %v297_v8 = vadd.f32 %v643_v0, %v598_v60 }
 0x19a   :  { %v645_v58 = vpop.f32.mrf.mxu1 }
 0x19b   :  { %v646_v59 = vadd.f32 %v645_v58, %v644_v57  ;;  %v310_v10 = vmul.f32 %v297_v8, %v297_v8  ;;  %v469_v57 = vsel %vm468_vm2, %v818_v12, 0 }
 0x19c   :  { %v647_v61 = vpop.f32.mrf.mxu1 }
 0x19d   :  { %v300_v62 = vadd.f32 %v646_v59, %v598_v60 }
 0x19e   :  { %v648_v63 = vpop.f32.mrf.mxu1 }
 0x19f   :  { %v649_v1 = vadd.f32 %v648_v63, %v647_v61  ;;  %v311_v2 = vmul.f32 %v300_v62, %v300_v62 }
 0x1a0   :  { %v650_v4 = vpop.f32.mrf.mxu1 }
 0x1a1   :  { %315 = vadd.xlane.f32.xlu1 %v311_v2  ;;  %v305_v6 = vadd.f32 %v649_v1, %v598_v60 }
 0x1a2   :  { %v651_v7 = vpop.f32.mrf.mxu1 }
 0x1a3   :  { %v312_v9 = vmul.f32 %v305_v6, %v305_v6 }
 0x1a5   :  { %317 = vadd.xlane.f32.xlu0 %v312_v9 }
 0x1a9   :  { %313 = vadd.xlane.f32.xlu0 %v310_v10 }
 0x22a   :  { %v316_v11 = vpop.xlane.xlu1 %315 }
 0x22b   :  { %v320_v13 = vmax.f32 %v316_v11, 1e-24 }
 0x22d   :  { %707 = vrsqrt.f32 %v320_v13  ;;  %v622_v13 = vld [vmem:[%s894_s6] ss:$0 sm:$0xff] }
 0x22e   :  { %v318_v14 = vpop.xlane.xlu0 %317 }
 0x22f   :  { %v321_v15 = vmax.f32 %v318_v14, 1e-24 }
 0x231   :  { %709 = vrsqrt.f32 %v321_v15  ;;  %v573_v15 = vld [vmem:[%s895_s7] sm:$0xff] }
 0x232   :  { %v314_v16 = vpop.xlane.xlu0 %313 }
 0x233   :  { %v319_v17 = vmax.f32 %v314_v16, 1e-24 }
 0x235   :  { %711 = vrsqrt.f32 %v319_v17 }
 0x23a   :  { %v708_v18 = vpop.eup %707 }
 0x23b   :  { %v326_v21 = vmul.f32 2.236068, %v708_v18 }
 0x23d   :  { %v329_v26 = vmul.f32 %v326_v21, %v300_v62 }
 0x23e   :  { %v710_v19 = vpop.eup %709 }
 0x23f   :  { %v327_v20 = vmul.f32 2.236068, %v710_v19 }
 0x241   :  { %v330_v22 = vmul.f32 %v327_v20, %v305_v6 }
 0x242   :  { %v712_v23 = vpop.eup %711 }
 0x243   :  { %v332_v24 = vpack.c.bf16 %v330_v22, %v330_v22  ;;  %v325_v25 = vmul.f32 2.236068, %v712_v23 }
 0x245   :  { %v328_v27 = vmul.f32 %v325_v25, %v297_v8  ;;  %662 = vmatprep.subr.bf16.mxu0 %v332_v24  ;;  %v335_v32 = vunpack.c.l.bf16 %v332_v24 }
 0x246   :  { %663 = vmatpush3.bf16.xpose.msra.mxu0 %v332_v24 }
 0x247   :  { %v331_v28 = vpack.c.bf16 %v329_v26, %v328_v27  ;;  %v386_v52 = vmul.f32 %v335_v32, %v335_v32 }
 0x249   :  { %664 = vmatprep.subr.bf16.mxu0 %v331_v28  ;;  %666 = vmatprep.mubr.bf16.mxu0 %v331_v28  ;;  %v333_v29 = vunpack.c.l.bf16 %v331_v28  ;;  %v334_v30 = vunpack.c.h.bf16 %v331_v28 }
 0x24b   :  { %v384_v31 = vmul.f32 %v333_v29, %v333_v29  ;;  %v393_v33 = vadd.f32 %v334_v30, %v333_v29  ;;  %v385_v35 = vmul.f32 %v334_v30, %v334_v30 }
 0x24d   :  { %387 = vadd.xlane.f32.xlu1 %v384_v31  ;;  %v394_v34 = vadd.f32 %v393_v33, %v335_v32 }
 0x24e   :  { %665 = vmatpush3.bf16.xpose.msra.mxu0 %v331_v28 }
 0x24f   :  { %v395_v36 = vmul.f32 %v394_v34, %v333_v29  ;;  %v396_v37 = vmul.f32 %v394_v34, %v334_v30  ;;  %v397_v38 = vmul.f32 %v394_v34, %v335_v32  ;;  %670 = vmatprep.subr.bf16.mxu0 %v734_v56 }
 0x251   :  { %389 = vadd.xlane.f32.xlu1 %v385_v35 }
 0x255   :  { %667 = vmatmul.mubr.bf16.vlgmr.msra.gmra.mxu0 %v332_v24 }
 0x256   :  { %671 = vmatpush3.bf16.msra.mxu0 %v469_v57  ;;  %674 = vmatprep.mubr.msk.bf16.mxu0 %vm735_vm3, %v734_v56 }
 0x257   :  { %672 = vmatprep.subr.bf16.mxu0 %v734_v56 }
 0x25a   :  { %673 = vmatpush3.bf16.msra.mxu0 %v796_v5  ;;  %v706_v5 = vld [vmem:[%s893_s5] sm:$0xff]  }
 0x25b   :  { %678 = vmatprep.subr.bf16.mxu0 %v734_v56 }
 0x2d6   :  { %v867_v58 = vpop.xlane.xlu1 %387 }
 0x2d7   :  { %v618_v59 = vadd.f32 -5.0, %v867_v58 }
 0x2d9   :  { %v419_v60 = vmul.f32 1.442695, %v618_v59 }
 0x2da   :  { %v390_v22 = vpop.xlane.xlu1 %389 }
 0x2db   :  { %v619_v24 = vadd.f32 -5.0, %v390_v22 }
 0x2dd   :  { %v421_v26 = vmul.f32 1.442695, %v619_v24 }
 0x315   :  { %v668_v39 = vpop.f32.mrf.mxu0 }
 0x316   :  { %v617_v43 = vadd.f32 -5.0, %v668_v39 }
 0x317   :  { %v370_v40 = vpop.f32.mrf.mxu0 }
 0x318   :  { %v615_v41 = vadd.f32 -5.0, %v370_v40  ;;  %v414_v47 = vmul.f32 1.442695, %v617_v43 }
 0x319   :  { %v669_v42 = vpop.f32.mrf.mxu0 }
 0x31a   :  { %v410_v44 = vmul.f32 1.442695, %v615_v41 }
 0x31b   :  { %v373_v45 = vpop.f32.mrf.mxu0 }
 0x31c   :  { %713 = vpow2.f32 %v410_v44  ;;  %v616_v46 = vadd.f32 -5.0, %v373_v45 }
 0x31e   :  { %v412_v48 = vmul.f32 1.442695, %v616_v46 }
 0x320   :  { %715 = vpow2.f32 %v412_v48 }
 0x321   :  { %717 = vpow2.f32 %v414_v47 }
 0x322   :  { %719 = vpow2.f32 %v419_v60 }
 0x329   :  { %v714_v49 = vpop.eup %713 }
 0x32a   :  { %v426_v50 = vsel %vm425_vm1, %v714_v49, 0.0 }
 0x32b   :  { %427 = vadd.xlane.f32.xlu0 %v426_v50 }
 0x32d   :  { %v716_v51 = vpop.eup %715 }
 0x32e   :  { %v429_v53 = vsel %vm425_vm1, %v716_v51, 0.0  ;;  %v718_v54 = vpop.eup %717 }
 0x32f   :  { %391 = vadd.xlane.f32.xlu0 %v386_v52  ;;  %430 = vadd.xlane.f32.xlu1 %v429_v53  ;;  %v432_v55 = vsel %vm425_vm1, %v718_v54, 0.0  ;;  %v720_v61 = vpop.eup %719 }
 0x333   :  { %433 = vadd.xlane.f32.xlu0 %v432_v55  ;;  %398 = vadd.xlane.f32.xlu1 %v395_v36 }
 0x337   :  { %400 = vadd.xlane.f32.xlu0 %v396_v37  ;;  %402 = vadd.xlane.f32.xlu1 %v397_v38 }
 0x3b4   :  { %v428_v62 = vpop.xlane.xlu0 %427 }
 0x3b5   :  { %v435_v63 = vsub.f32 %v428_v62, %v720_v61 }
 0x3b7   :  { %721 = vrcp.f32 %v435_v63 }
 0x3b8   :  { %v392_v23 = vpop.xlane.xlu0 %391  ;;  %723 = vpow2.f32 %v421_v26  ;;  %v431_v28 = vpop.xlane.xlu1 %430 }
 0x3b9   :  { %v620_v25 = vadd.f32 -5.0, %v392_v23 }
 0x3bb   :  { %v423_v27 = vmul.f32 1.442695, %v620_v25 }
 0x3bc   :  { %v434_v32 = vpop.xlane.xlu0 %433  ;;  %v399_v40 = vpop.xlane.xlu1 %398 }
 0x3bd   :  { %725 = vpow2.f32 %v423_v27  ;;  %v404_v50 = vsub.f32 %v399_v40, %v867_v58 }
 0x3c0   :  { %v401_v44 = vpop.xlane.xlu0 %400  ;;  %v403_v46 = vpop.xlane.xlu1 %402 }
 0x3c1   :  { %v405_v48 = vsub.f32 %v401_v44, %v390_v22  ;;  %v406_v52 = vsub.f32 %v403_v46, %v392_v23 }
 0x3c4   :  { %v722_v0 = vpop.eup %721 }
 0x3c5   :  { %v463_v12 = vmul.f32 %v722_v0, %v714_v49  ;;  %v511_v1 = vmul.f32 %v722_v0, %v720_v61  ;;  %v724_v29 = vpop.eup %723 }
 0x3c6   :  { %v436_v31 = vsub.f32 %v431_v28, %v724_v29 }
 0x3c7   :  { %v464_v2 = vpack.c.bf16 %v463_v12, %v463_v12  ;;  %v512_v4 = vmul.f32 %v511_v1, %v790_v3 }
 0x3c8   :  { %727 = vlog2.f32 %v436_v31 }
 0x3c9   :  { %675 = vmatmul.mubr.msk.bf16.vlgmr.msra.gmra.mxu0 %vm425_vm1, %v464_v2  ;;  %729 = vlog2.f32 %v435_v63 }
 0x3ca   :  { %679 = vmatpush3.bf16.msra.mxu0 %v706_v5  ;;  %680 = vmatprep.mubr.msk.bf16.mxu0 %vm735_vm3, %v734_v56  ;;  %v726_v30 = vpop.eup %725 }
 0x3cb   :  { %v437_v33 = vsub.f32 %v434_v32, %v726_v30 }
 0x3cd   :  { %731 = vlog2.f32 %v437_v33 }
 0x3d5   :  { %v728_v34 = vpop.eup %727 }
 0x3d6   :  { %v730_v35 = vpop.eup %729  ;;  %v441_v37 = vmul.f32 0.6931472, %v728_v34 }
 0x3d7   :  { %v439_v39 = vmul.f32 0.6931472, %v730_v35 }
 0x3d8   :  { %v445_v41 = vadd.f32 5.0, %v441_v37 }
 0x3d9   :  { %v444_v42 = vadd.f32 5.0, %v439_v39 }
 0x3da   :  { %v732_v36 = vpop.eup %731  ;;  %v448_v45 = vmul.f32 2.0, %v445_v41 }
 0x3db   :  { %v443_v38 = vmul.f32 0.6931472, %v732_v36  ;;  %v447_v47 = vmul.f32 2.0, %v444_v42 }
 0x3dc   :  { %v451_v51 = vsub.f32 %v448_v45, %v405_v48 }
 0x3dd   :  { %v446_v43 = vadd.f32 5.0, %v443_v38  ;;  %v450_v53 = vsub.f32 %v447_v47, %v404_v50 }
 0x3df   :  { %v449_v49 = vmul.f32 2.0, %v446_v43  ;;  %v453_v55 = vadd.f32 %v451_v51, %v450_v53 }
 0x3e1   :  { %v452_v54 = vsub.f32 %v449_v49, %v406_v52 }
 0x3e3   :  { %v454_v56 = vadd.f32 %v453_v55, %v452_v54 }
 0x3e5   :  { %v455_v57 = vrot.slane %v454_v56, 4 }
 0x3e7   :  { %v456_v59 = vadd.f32 %v455_v57, %v454_v56 }
 0x3e9   :  { %v457_v60 = vrot.slane %v456_v59, 2 }
 0x3eb   :  { %v458_v62 = vadd.f32 %v457_v60, %v456_v59 }
 0x3ed   :  { %v459_v12 = vrot.slane %v458_v62, 1 }
 0x3ef   :  { %v460_v2 = vadd.f32 %v459_v12, %v458_v62 }
 0x3f1   :  { %v461_v58 = vmul.f32 0.041666668, %v460_v2 }
 0x489   :  { %v505_v6 = vpop.f32.mrf.mxu0 }
 0x48a   :  { %v513_v7 = vsub.f32 %v505_v6, %v512_v4 }
 0x48b   :  { %v676_v8 = vpop.f32.mrf.mxu0 }
 0x48c   :  { %v514_v9 = vpack.c.bf16 %v513_v7, %v513_v7 }
 0x48d   :  { %v508_v10 = vpop.f32.mrf.mxu0 }
 0x48e   :  { %681 = vmatmul.mubr.msk.bf16.vlgmr.msra.gmra.mxu0 %vm59_vm0, %v514_v9 }
 0x48f   :  { %v677_v11 = vpop.f32.mrf.mxu0 }
 0x54e   :  { %v567_v14 = vpop.f32.mrf.mxu0 }
 0x54f   :  { %v568_v16 = vadd.f32 %v622_v13, %v567_v14 }
 0x550   :  { %v682_v17 = vpop.f32.mrf.mxu0 }
 0x551   :  { %v574_v3 = vsub.f32 %v568_v16, %v573_v15 }
 0x552   :  { %v570_v18 = vpop.f32.mrf.mxu0 }
 0x553   :  { %v575_v19 = vmul.f32 %v574_v3, %v574_v3 }
 0x554   :  { %v683_v20 = vpop.f32.mrf.mxu0 }
 0x555   :  { %v576_v21 = vsel %vm59_vm0, %v575_v19, 0.0 }
 0x556   :  { %577 = vadd.xlane.f32.xlu0 %v576_v21 }
 0x5df   :  { %v578_v61 = vpop.xlane.xlu0 %577 }
 0x5e0   :  { %v579_v63 = vrot.slane %v578_v61, 4 }
 0x5e2   :  { %v580_v0 = vadd.f32 %v579_v63, %v578_v61 }
 0x5e4   :  { %v581_v1 = vrot.slane %v580_v0, 2 }
 0x5e6   :  { %v582_v5 = vadd.f32 %v581_v1, %v580_v0 }
 0x5e8   :  { %v583_v4 = vrot.slane %v582_v5, 1 }
 0x5ea   :  { %v584_v6 = vadd.f32 %v583_v4, %v582_v5 }
 0x5ec   :  { %v585_v7 = vmul.f32 0.0078125, %v584_v6 }
 0x5ee   :  { %v587_v8 = vsel %vm586_vm4, %v585_v7, %v461_v58 }
 0x5ef   :  { %589 = vst.msk [vmem:[%s896_s8] sm:$0x1] %vm588_vm5, %v587_v8 }

</bundles_post_ra>
